<compile_context>
chip_gen: v5e
topology: v5e:2x2
jax: 0.10.0
libtpu: 0.0.40
codegen_flags: <defaults>
</compile_context>

<pallas_src>
import functools
import re

import jax
import jax.numpy as jnp
from jax.experimental import pallas as pl
from jax.experimental.pallas import tpu as pltpu


# ---------------------------------------------------------------------------
# Hardware query (gate bf16 math / megacore splitting / VMEM budget per chip).
# ---------------------------------------------------------------------------
@functools.lru_cache(maxsize=1)
def _tpu_target():
    """Returns (generation, multi_tensorcore, vmem_capacity_bytes_or_None)."""
    gen, multi_tc, vmem_phys = 0, False, None
    try:
        dev = jax.devices()[0]
        kind = (getattr(dev, "device_kind", "") or "").lower()
        if getattr(dev, "platform", "") == "tpu":
            m = re.search(r"(\d+)", kind)
            if m:
                gen = int(m.group(1))
            # Chips with 2 TensorCores sharing HBM: v4, v5p, v7x+.
            multi_tc = (gen >= 7 or gen == 4
                        or "v5p" in kind
                        or (gen == 5 and "lite" not in kind and "5e" not in kind))
    except Exception:
        pass
    try:
        vmem_phys = int(pltpu.get_tpu_info().vmem_capacity_bytes)
    except Exception:
        vmem_phys = None
    return gen, multi_tc, vmem_phys


# ---------------------------------------------------------------------------
# Kernel body: per-element MLP, feature axis unrolled into VPU scalar-broadcast ops.
# ---------------------------------------------------------------------------
def _make_kernel(width: int, n_hidden: int, math_dtype: str):
    mdt = jnp.bfloat16 if math_dtype == "bfloat16" else jnp.float32

    def kernel(p_ref, a_ref, o_ref):
        # p_ref: flat f32 parameter vector in SMEM (cheap scalar reads -> VPU broadcasts)
        # a_ref / o_ref: (TM, LANE_W) VMEM tiles in the caller's dtype.
        x = a_ref[...].astype(mdt)

        off = 0
        # input linear: (width, 1) weight + (width,) bias, ReLU
        w_in = [p_ref[off + k].astype(mdt) for k in range(width)]
        off += width
        b_in = [p_ref[off + k].astype(mdt) for k in range(width)]
        off += width
        h = [jnp.maximum(x * w_in[k] + b_in[k], 0.0) for k in range(width)]

        # applied hidden linears: (width, width) weight + (width,) bias, ReLU
        for _ in range(n_hidden):
            W = [[p_ref[off + i * width + j].astype(mdt) for j in range(width)]
                 for i in range(width)]
            off += width * width
            b = [p_ref[off + i].astype(mdt) for i in range(width)]
            off += width
            h_new = []
            for i in range(width):
                acc = h[0] * W[i][0]
                for j in range(1, width):
                    acc = acc + h[j] * W[i][j]
                h_new.append(jnp.maximum(acc + b[i], 0.0))
            h = h_new

        # output linear: (1, width) weight + (1,) bias, no activation
        w_out = [p_ref[off + k].astype(mdt) for k in range(width)]
        off += width
        b_out = p_ref[off].astype(mdt)
        y = h[0] * w_out[0]
        for k in range(1, width):
            y = y + h[k] * w_out[k]
        o_ref[...] = (y + b_out).astype(o_ref.dtype)

    return kernel


# ---------------------------------------------------------------------------
# Tiling / VMEM budgeting.
# ---------------------------------------------------------------------------
def _choose_tiling(n: int, itemsize: int, multi_tc: bool, small_vmem: bool):
    """Pick (lane_w, rows, tm, needs_pad) for a flat element count n."""
    sub_min = max(8, 32 // max(1, itemsize))  # sublane packing granule for the I/O dtype

    # Lane-dense slab width.  Prefer widths that divide n exactly (free reshape, no
    # wrapper-side pad/slice passes), and that leave at least sub_min rows.
    lane_w = 0
    for cand in (1024, 512, 256, 128):
        if n % cand == 0 and n // cand >= sub_min:
            lane_w = cand
            break
    if lane_w == 0:
        for cand in (1024, 512, 256, 128):
            if n % cand == 0 and n >= cand:
                lane_w = cand
                break
    needs_pad = lane_w == 0
    if needs_pad:  # lane-ragged fallback (n % 128 != 0): small pad, keep (8,128)-aligned
        for cand in (1024, 512, 256):
            if n >= cand * sub_min:
                lane_w = cand
                break
        else:
            lane_w = 128
        rows = -(-n // lane_w)
        rows = ((rows + sub_min - 1) // sub_min) * sub_min
    else:
        rows = n // lane_w

    # Per-block row cap: big enough to amortize the ~0.35us grid-step cost and the
    # SMEM scalar reads, small enough that double-buffered I/O plus the ~dozen live
    # per-element intermediates fit comfortably in VMEM on every generation.
    max_block_elems = (128 if small_vmem else 256) * 1024
    cap_rows = max(1, max_block_elems // lane_w)

    tm = min(rows, cap_rows)
    if tm < rows:  # keep non-full blocks sublane-aligned
        tm = max(sub_min, (tm // sub_min) * sub_min)

    # Multi-TensorCore chips only: for small grids force an even block count so both
    # cores get equal work (3 blocks would idle one core ~33%).  Single-TC chips skip
    # this (a forced split would only add grid-step overhead).
    if multi_tc and rows > sub_min:
        nblk = -(-rows // tm)
        if nblk < 8:
            target = max(2, nblk + (nblk % 2))
            cand = -(-rows // target)
            if cand < rows:
                cand = ((cand + sub_min - 1) // sub_min) * sub_min
            while cand > sub_min and -(-rows // cand) < target:
                cand -= sub_min
            if cand >= 1 and (-(-rows // cand)) % 2 == 0:
                tm = cand

    return lane_w, rows, tm, needs_pad


def _vmem_limit_bytes(tm: int, lane_w: int, io_itemsize: int, math_itemsize: int,
                      vmem_phys):
    io_bytes = tm * lane_w * io_itemsize
    math_bytes = tm * lane_w * math_itemsize
    # double-buffered in + out blocks, ~14 live math-dtype tile values, 2 MiB headroom
    budget = 4 * io_bytes + 14 * math_bytes + (2 << 20)
    limit = max(budget, 32 << 20)
    cap = 48 << 20
    if vmem_phys:
        cap = min(cap, max(vmem_phys - (16 << 20), 16 << 20))
    return int(min(limit, cap))


# ---------------------------------------------------------------------------
# pallas_call runner.
# ---------------------------------------------------------------------------
@functools.partial(
    jax.jit,
    static_argnames=("width", "n_hidden", "tm", "math_dtype", "vmem_limit",
                     "flops", "bytes_accessed"))
def _run_pallas(a2d, pvec, *, width, n_hidden, tm, math_dtype, vmem_limit,
                flops, bytes_accessed):
    rows, lane_w = a2d.shape
    grid = pl.cdiv(rows, tm)
    kernel = _make_kernel(width, n_hidden, math_dtype)
    return pl.pallas_call(
        kernel,
        out_shape=jax.ShapeDtypeStruct((rows, lane_w), a2d.dtype),
        grid=(grid,),
        in_specs=[
            pl.BlockSpec(memory_space=pltpu.MemorySpace.SMEM),  # params, whole vector
            pl.BlockSpec((tm, lane_w), lambda i: (i, 0)),
        ],
        out_specs=pl.BlockSpec((tm, lane_w), lambda i: (i, 0)),
        compiler_params=pltpu.CompilerParams(
            dimension_semantics=("parallel",),
            vmem_limit_bytes=vmem_limit),
        cost_estimate=pl.CostEstimate(
            flops=flops, transcendentals=0, bytes_accessed=bytes_accessed),
    )(pvec, a2d)


# ---------------------------------------------------------------------------
# Public wrapper: mirrors NNActivationConditioned.forward (ReLU activation).
# ---------------------------------------------------------------------------
def nn_activation_conditioned(a, conditional_params, *, width=5, hidden_layers=1,
                              indim=1, strict_torch_slicing=True):
    num_params = 2 * hidden_layers + 4
    params = list(conditional_params)
    assert len(params) == num_params, (
        f"Passed parameters do not match architecture of the network: "
        f"{len(params)}!={num_params}")
    if params[0].ndim > 2 and params[0].shape[0] == 1:
        params = [p[0] for p in params]  # == squeeze(0)
    assert indim == 1, "forward unsqueezes a scalar feature dim -> indim must be 1"

    fci_weight, fci_bias = params[0], params[1]
    if strict_torch_slicing:
        # Exactly the expressions from the reference forward() (see header note).
        fc_weights = params[2:2 + num_params // 2 - 1]
        fc_biases = params[2 + num_params // 2 - 1:-2]
    else:
        fc_weights = params[2:2 + hidden_layers]
        fc_biases = params[2 + hidden_layers:2 + 2 * hidden_layers]
    fco_weight, fco_bias = params[-2], params[-1]
    hidden_pairs = list(zip(fc_weights, fc_biases))  # zip truncates, as in torch
    n_hidden = len(hidden_pairs)

    # Flatten the used parameters into one small f32 vector (SMEM-resident in-kernel).
    pieces = [fci_weight, fci_bias]
    for w, b in hidden_pairs:
        pieces += [w, b]
    pieces += [fco_weight, fco_bias]
    pvec = jnp.concatenate(
        [jnp.asarray(p).astype(jnp.float32).reshape(-1) for p in pieces])

    gen, multi_tc, vmem_phys = _tpu_target()
    use_bf16_math = (a.dtype == jnp.bfloat16) and gen >= 6  # packed bf16 VALU on v6e+
    math_dtype = "bfloat16" if use_bf16_math else "float32"
    math_itemsize = 2 if use_bf16_math else 4
    small_vmem = (gen >= 7) or (vmem_phys is not None and vmem_phys <= (64 << 20))

    orig_shape = a.shape
    flat = a.reshape(-1)  # free; keeps the caller dtype end-to-end (bf16 halves HBM)
    n = int(flat.shape[0])
    itemsize = flat.dtype.itemsize
    lane_w, rows, tm, needs_pad = _choose_tiling(n, itemsize, multi_tc, small_vmem)

    if needs_pad:
        # Only for lane-ragged sizes (n % 128 != 0); multiples of 128 take the
        # zero-copy path with no extra HBM pad/slice passes.
        flat = jnp.pad(flat, (0, rows * lane_w - n))
    a2d = flat.reshape(rows, lane_w)

    flops_per_elem = (2 * width + width
                      + n_hidden * (2 * width * width + 2 * width)
                      + 2 * width + 1)
    flops = int(flops_per_elem) * rows * lane_w
    bytes_accessed = int(2 * rows * lane_w * itemsize + 4 * pvec.shape[0])
    vmem_limit = _vmem_limit_bytes(tm, lane_w, itemsize, math_itemsize, vmem_phys)

    out2d = _run_pallas(a2d, pvec, width=width, n_hidden=n_hidden, tm=tm,
                        math_dtype=math_dtype, vmem_limit=vmem_limit,
                        flops=flops, bytes_accessed=bytes_accessed)
    out = out2d.reshape(-1)
    if needs_pad:
        out = out[:n]
    return out.reshape(orig_shape)


# ---------------------------------------------------------------------------
# Pure-jnp reference that mirrors the torch forward() line-for-line.
# ---------------------------------------------------------------------------
def _reference_torch(a, params, width, hidden_layers, strict=True):
    num_params = 2 * hidden_layers + 4
    params = list(params)
    if params[0].ndim > 2 and params[0].shape[0] == 1:
        params = [p[0] for p in params]
    fci_w, fci_b = params[0], params[1]
    if strict:
        fc_weights = params[2:2 + num_params // 2 - 1]
        fc_biases = params[2 + num_params // 2 - 1:-2]
    else:
        fc_weights = params[2:2 + hidden_layers]
        fc_biases = params[2 + hidden_layers:2 + 2 * hidden_layers]
    fco_w, fco_b = params[-2], params[-1]
    x = a[..., None].astype(jnp.float32)
    x = jnp.maximum(x @ fci_w.T + fci_b, 0.0)
    for w, b in zip(fc_weights, fc_biases):
        x = jnp.maximum(x @ w.T + b, 0.0)
    x = x @ fco_w.T + fco_b
    return x[..., 0]


if __name__ == "__main__":
    key = jax.random.PRNGKey(0)

    def make_params(k, width, hidden_layers, indim=1):
        shapes = ([(width, indim), (width,)]
                  + [(width, width) for _ in range(hidden_layers)]
                  + [(width,) for _ in range(hidden_layers)]
                  + [(indim, width), (indim,)])
        keys = jax.random.split(k, len(shapes))
        return [0.5 * jax.random.normal(kk, s, dtype=jnp.float32)
                for kk, s in zip(keys, shapes)]

    k_p1, k_p3, k_x1, k_x2 = jax.random.split(key, 4)
    width = 5
    params1 = make_params(k_p1, width, 1)
    params3 = make_params(k_p3, width, 3)

    # 1) Default config (hidden_layers=1), NCHW-style f32 input, strict torch slicing.
    x = jax.random.normal(k_x1, (2, 4, 16, 16), dtype=jnp.float32)
    y = jax.block_until_ready(
        nn_activation_conditioned(x, params1, width=width, hidden_layers=1))
    y_ref = _reference_torch(x, params1, width, 1, strict=True)
    assert y.shape == x.shape
    assert jnp.allclose(y, y_ref, atol=1e-5, rtol=1e-5), float(jnp.max(jnp.abs(y - y_ref)))

    # 2) Deeper config (hidden_layers=3) exercises the unrolled hidden-layer path.
    y3 = jax.block_until_ready(
        nn_activation_conditioned(x, params3, width=width, hidden_layers=3))
    y3_ref = _reference_torch(x, params3, width, 3, strict=True)
    assert jnp.allclose(y3, y3_ref, atol=1e-5, rtol=1e-5), float(jnp.max(jnp.abs(y3 - y3_ref)))

    # 3) "Architectural" pairing (weight[i]/bias[i], all hidden layers applied).
    ya = jax.block_until_ready(
        nn_activation_conditioned(x, params1, width=width, hidden_layers=1,
                                  strict_torch_slicing=False))
    ya_ref = _reference_torch(x, params1, width, 1, strict=False)
    assert jnp.allclose(ya, ya_ref, atol=1e-5, rtol=1e-5), float(jnp.max(jnp.abs(ya - ya_ref)))

    # 4) Lane-ragged size (exercises the pad fallback), deeper config.
    x2 = jax.random.normal(k_x2, (3, 7, 11), dtype=jnp.float32)
    y2 = jax.block_until_ready(
        nn_activation_conditioned(x2, params3, width=width, hidden_layers=3))
    y2_ref = _reference_torch(x2, params3, width, 3, strict=True)
    assert y2.shape == x2.shape
    assert jnp.allclose(y2, y2_ref, atol=1e-5, rtol=1e-5), float(jnp.max(jnp.abs(y2 - y2_ref)))

    # 5) bf16 I/O passes straight through; math is bf16 on v6e+ (f32 elsewhere), so
    #    compare with a generous, scale-aware tolerance.
    xb = x.astype(jnp.bfloat16)
    yb = jax.block_until_ready(
        nn_activation_conditioned(xb, params1, width=width, hidden_layers=1,
                                  strict_torch_slicing=False))
    yb_ref = _reference_torch(xb.astype(jnp.float32), params1, width, 1, strict=False)
    assert yb.dtype == jnp.bfloat16 and yb.shape == xb.shape
    err = jnp.abs(yb.astype(jnp.float32) - yb_ref)
    scale = float(jnp.max(jnp.abs(yb_ref))) + 1e-6
    assert float(jnp.max(err)) <= 0.05 * scale + 0.05, (float(jnp.max(err)), scale)
    assert float(jnp.mean(err)) <= 0.02, float(jnp.mean(err))

    print("KERNEL_OK")
</pallas_src>

<mosaic_0001>
module attributes {stable_mosaic.version = 11 : i64} {
  func.func @kernel(%arg0: i32, %arg1: memref<16xf32, #tpu.memory_space<smem>>, %arg2: memref<8x256xf32, #tpu.memory_space<vmem>>, %arg3: memref<8x256xf32, #tpu.memory_space<vmem>>) attributes {dimension_semantics = [#tpu.dimension_semantics<parallel>], iteration_bounds = array<i64: 1>, scalar_prefetch = 0 : i64, scratch_operands = 0 : i64, tpu.core_type = #tpu.core_type<tc>, window_params = [{transform_indices = @transform_0, window_bounds = array<i64: 16>}, {transform_indices = @transform_1, window_bounds = array<i64: 8, 256>}, {transform_indices = @transform_2, window_bounds = array<i64: 8, 256>}]} {
    %c0 = arith.constant 0 : index
    %c0_0 = arith.constant 0 : index
    %0 = vector.load %arg2[%c0, %c0_0] : memref<8x256xf32, #tpu.memory_space<vmem>>, vector<8x256xf32>
    %c0_1 = arith.constant 0 : index
    %1 = memref.load %arg1[%c0_1] : memref<16xf32, #tpu.memory_space<smem>>
    %c1 = arith.constant 1 : index
    %2 = memref.load %arg1[%c1] : memref<16xf32, #tpu.memory_space<smem>>
    %c2 = arith.constant 2 : index
    %3 = memref.load %arg1[%c2] : memref<16xf32, #tpu.memory_space<smem>>
    %c3 = arith.constant 3 : index
    %4 = memref.load %arg1[%c3] : memref<16xf32, #tpu.memory_space<smem>>
    %c4 = arith.constant 4 : index
    %5 = memref.load %arg1[%c4] : memref<16xf32, #tpu.memory_space<smem>>
    %c5 = arith.constant 5 : index
    %6 = memref.load %arg1[%c5] : memref<16xf32, #tpu.memory_space<smem>>
    %c6 = arith.constant 6 : index
    %7 = memref.load %arg1[%c6] : memref<16xf32, #tpu.memory_space<smem>>
    %c7 = arith.constant 7 : index
    %8 = memref.load %arg1[%c7] : memref<16xf32, #tpu.memory_space<smem>>
    %c8 = arith.constant 8 : index
    %9 = memref.load %arg1[%c8] : memref<16xf32, #tpu.memory_space<smem>>
    %c9 = arith.constant 9 : index
    %10 = memref.load %arg1[%c9] : memref<16xf32, #tpu.memory_space<smem>>
    %11 = vector.broadcast %1 : f32 to vector<8x256xf32>
    %12 = arith.mulf %0, %11 : vector<8x256xf32>
    %13 = vector.broadcast %6 : f32 to vector<8x256xf32>
    %14 = arith.addf %12, %13 : vector<8x256xf32>
    %cst = arith.constant 0.000000e+00 : f32
    %15 = vector.broadcast %cst : f32 to vector<8x256xf32>
    %16 = arith.maximumf %14, %15 : vector<8x256xf32>
    %17 = vector.broadcast %2 : f32 to vector<8x256xf32>
    %18 = arith.mulf %0, %17 : vector<8x256xf32>
    %19 = vector.broadcast %7 : f32 to vector<8x256xf32>
    %20 = arith.addf %18, %19 : vector<8x256xf32>
    %cst_2 = arith.constant 0.000000e+00 : f32
    %21 = vector.broadcast %cst_2 : f32 to vector<8x256xf32>
    %22 = arith.maximumf %20, %21 : vector<8x256xf32>
    %23 = vector.broadcast %3 : f32 to vector<8x256xf32>
    %24 = arith.mulf %0, %23 : vector<8x256xf32>
    %25 = vector.broadcast %8 : f32 to vector<8x256xf32>
    %26 = arith.addf %24, %25 : vector<8x256xf32>
    %cst_3 = arith.constant 0.000000e+00 : f32
    %27 = vector.broadcast %cst_3 : f32 to vector<8x256xf32>
    %28 = arith.maximumf %26, %27 : vector<8x256xf32>
    %29 = vector.broadcast %4 : f32 to vector<8x256xf32>
    %30 = arith.mulf %0, %29 : vector<8x256xf32>
    %31 = vector.broadcast %9 : f32 to vector<8x256xf32>
    %32 = arith.addf %30, %31 : vector<8x256xf32>
    %cst_4 = arith.constant 0.000000e+00 : f32
    %33 = vector.broadcast %cst_4 : f32 to vector<8x256xf32>
    %34 = arith.maximumf %32, %33 : vector<8x256xf32>
    %35 = vector.broadcast %5 : f32 to vector<8x256xf32>
    %36 = arith.mulf %0, %35 : vector<8x256xf32>
    %37 = vector.broadcast %10 : f32 to vector<8x256xf32>
    %38 = arith.addf %36, %37 : vector<8x256xf32>
    %cst_5 = arith.constant 0.000000e+00 : f32
    %39 = vector.broadcast %cst_5 : f32 to vector<8x256xf32>
    %40 = arith.maximumf %38, %39 : vector<8x256xf32>
    %c10 = arith.constant 10 : index
    %41 = memref.load %arg1[%c10] : memref<16xf32, #tpu.memory_space<smem>>
    %c11 = arith.constant 11 : index
    %42 = memref.load %arg1[%c11] : memref<16xf32, #tpu.memory_space<smem>>
    %c12 = arith.constant 12 : index
    %43 = memref.load %arg1[%c12] : memref<16xf32, #tpu.memory_space<smem>>
    %c13 = arith.constant 13 : index
    %44 = memref.load %arg1[%c13] : memref<16xf32, #tpu.memory_space<smem>>
    %c14 = arith.constant 14 : index
    %45 = memref.load %arg1[%c14] : memref<16xf32, #tpu.memory_space<smem>>
    %c15 = arith.constant 15 : index
    %46 = memref.load %arg1[%c15] : memref<16xf32, #tpu.memory_space<smem>>
    %47 = vector.broadcast %41 : f32 to vector<8x256xf32>
    %48 = arith.mulf %16, %47 : vector<8x256xf32>
    %49 = vector.broadcast %42 : f32 to vector<8x256xf32>
    %50 = arith.mulf %22, %49 : vector<8x256xf32>
    %51 = arith.addf %48, %50 : vector<8x256xf32>
    %52 = vector.broadcast %43 : f32 to vector<8x256xf32>
    %53 = arith.mulf %28, %52 : vector<8x256xf32>
    %54 = arith.addf %51, %53 : vector<8x256xf32>
    %55 = vector.broadcast %44 : f32 to vector<8x256xf32>
    %56 = arith.mulf %34, %55 : vector<8x256xf32>
    %57 = arith.addf %54, %56 : vector<8x256xf32>
    %58 = vector.broadcast %45 : f32 to vector<8x256xf32>
    %59 = arith.mulf %40, %58 : vector<8x256xf32>
    %60 = arith.addf %57, %59 : vector<8x256xf32>
    %61 = vector.broadcast %46 : f32 to vector<8x256xf32>
    %62 = arith.addf %60, %61 : vector<8x256xf32>
    %c0_6 = arith.constant 0 : index
    %c0_7 = arith.constant 0 : index
    %63 = vector.load %arg3[%c0_6, %c0_7] : memref<8x256xf32, #tpu.memory_space<vmem>>, vector<8x256xf32>
    tpu.vector_store %arg3[%c0_6, %c0_7], %62 {strides = array<i32>} : memref<8x256xf32, #tpu.memory_space<vmem>>, vector<8x256xf32>,
    return
  }
  func.func @transform_0(%arg0: i32) -> i32 {
    %c0_i32 = arith.constant 0 : i32
    %c0_i32_0 = arith.constant 0 : i32
    return %c0_i32 : i32
  }
  func.func @transform_1(%arg0: i32) -> (i32, i32) {
    %c0_i32 = arith.constant 0 : i32
    %c0_i32_0 = arith.constant 0 : i32
    return %arg0, %c0_i32 : i32, i32
  }
  func.func @transform_2(%arg0: i32) -> (i32, i32) {
    %c0_i32 = arith.constant 0 : i32
    %c0_i32_0 = arith.constant 0 : i32
    return %arg0, %c0_i32 : i32, i32
  }
}

</mosaic_0001>

<bundles_post_ra>
// kernel: _run_pallas.1
= control target key start
LH: loop header
LB: loop body
LE: loop exit
PB: predicated region body
PF: predicated region fallthrough
CT: control target
= control target key end

     0   :  { %7 = vsyncpa [#allocation5], 0  ;;  %s284_s0 = inlined_call_operand.hbm [shape: f32[16], index: 0, kind: input, shape index: {}]   ;;  %s285_s1 = inlined_call_operand.hbm [shape: f32[8,256], index: 1, kind: input, shape index: {}]   ;;  %s286_s2 = inlined_call_operand.hbm [shape: f32[8,256], index: 2, kind: output, shape index: {}]  }
   0x1   :  { %8 = vsyncpa [#allocation3], 0 }
   0x2   :  { %9 = vsyncpa [#allocation4], 0  ;;  %s15_s11 = sshll.u32 %s284_s0, 4  ;;  %s24_s14 = sshll.u32 %s285_s1, 4  ;;  %s16_s11 = int_to_ptr.hbm [resolvable:$true] %s15_s11  ;;  %s25_s14 = int_to_ptr.hbm [resolvable:$true] %s24_s14 }
   0x3   :  { %s227_s15 = smov [#allocation2]   ;;  %s228_s16 = smov [#allocation6]  }
   0x4   :  { %18 = dma.hbm_to_smem %s16_s11, 16, %s227_s15, [#allocation5]  }
   0x5   :  { %s26_s17 = sshll.u32 %s228_s16, 4  ;;  %s27_s17 = int_to_ptr.vmem [resolvable:$true] %s26_s17 }
   0x6   :  { %29 = dma.hbm_to_vmem [thread:$0]  %s25_s14, 256, %s27_s17, [#allocation3]  }
   0x7   :  { %221 = dma.done.wait [#allocation5], 16  }
   0x8   :  { %222 = vsyncadd [#allocation5], 4294967280 }
   0x9   :  { %223 = dma.done.wait [#allocation3], 256  }
   0xa   :  { %224 = vsyncadd [#allocation3], 4294967040 }
   0xb   :  { %38 = sfence }
   0xc   :  { %s41_s18 = sld [smem:[#allocation2]]  ;;  %v39_v0 = vld [vmem:[#allocation6] sm:$0xff]  ;;  %v40_v1 = vld [vmem:[#allocation6 + $0x8] sm:$0xff]  ;;  %s229_s4 = smov [#allocation7]  }
   0xd   :  { %s143_s19 = sld [smem:[#allocation2 + $0x1]]  ;;  %s130_s5 = sshll.u32 %s229_s4, 4  ;;  %s131_s5 = int_to_ptr.vmem [resolvable:$true] %s130_s5 }
   0xe   :  { %s144_s0 = sld [smem:[#allocation2 + $0x2]]  ;;  %s132_s8 = sshll.u32 %s286_s2, 4  ;;  %s133_s8 = int_to_ptr.hbm [resolvable:$true] %s132_s8 }
   0xf   :  { %s145_s20 = sld [smem:[#allocation2 + $0x3]] }
  0x10   :  { %s251_s21 = sld [smem:[#allocation2 + $0x4]] }
  0x11   :  { %s147_s1 = sld [smem:[#allocation2 + $0x5]] }
  0x12   :  { %s148_s22 = sld [smem:[#allocation2 + $0x6]]  ;;  %v51_v2 = vstv %s41_s18 }
  0x13   :  { %s253_s23 = sld [smem:[#allocation2 + $0x7]]  ;;  %v59_v3 = vstv %s143_s19  ;;  %v52_v4 = vmul.f32 %v51_v2, %v39_v0  ;;  %v53_v6 = vmul.f32 %v51_v2, %v40_v1 }
  0x14   :  { %s255_s24 = sld [smem:[#allocation2 + $0x8]]  ;;  %v67_v5 = vstv %s144_s0  ;;  %v60_v7 = vmul.f32 %v59_v3, %v39_v0  ;;  %v61_v9 = vmul.f32 %v59_v3, %v40_v1 }
  0x15   :  { %s257_s25 = sld [smem:[#allocation2 + $0x9]]  ;;  %v75_v8 = vstv %s145_s20  ;;  %v68_v10 = vmul.f32 %v67_v5, %v39_v0  ;;  %v69_v14 = vmul.f32 %v67_v5, %v40_v1 }
  0x16   :  { %v83_v11 = vstv %s251_s21  ;;  %s260_s26 = sld [smem:[#allocation2 + $0xa]]  ;;  %v76_v13 = vmul.f32 %v75_v8, %v39_v0  ;;  %v77_v15 = vmul.f32 %v75_v8, %v40_v1 }
  0x17   :  { %v54_v12 = vstv %s147_s1  ;;  %s262_s27 = sld [smem:[#allocation2 + $0xb]]  ;;  %v84_v18 = vmul.f32 %v83_v11, %v39_v0  ;;  %v85_v23 = vmul.f32 %v83_v11, %v40_v1 }
  0x18   :  { %v55_v16 = vadd.f32 %v54_v12, %v52_v4  ;;  %v62_v17 = vstv %s148_s22  ;;  %s264_s28 = sld [smem:[#allocation2 + $0xc]]  ;;  %v56_v19 = vadd.f32 %v54_v12, %v53_v6 }
  0x19   :  { %v63_v20 = vadd.f32 %v62_v17, %v60_v7  ;;  %v70_v21 = vstv %s253_s23  ;;  %s267_s29 = sld [smem:[#allocation2 + $0xd]]  ;;  %v64_v22 = vadd.f32 %v62_v17, %v61_v9 }
  0x1a   :  { %v57_v24 = vmax.f32 %v55_v16, 0.0  ;;  %v71_v25 = vadd.f32 %v70_v21, %v68_v10  ;;  %v78_v26 = vstv %s255_s24  ;;  %s270_s30 = sld [smem:[#allocation2 + $0xe]]  ;;  %v58_v27 = vmax.f32 %v56_v19, 0.0 }
  0x1b   :  { %v65_v28 = vmax.f32 %v63_v20, 0.0  ;;  %v79_v29 = vadd.f32 %v78_v26, %v76_v13  ;;  %v86_v30 = vstv %s257_s25  ;;  %v66_v31 = vmax.f32 %v64_v22, 0.0  ;;  %s274_s3 = sld [smem:[#allocation2 + $0xf]] }
  0x1c   :  { %v73_v32 = vmax.f32 %v71_v25, 0.0  ;;  %v87_v33 = vadd.f32 %v86_v30, %v84_v18  ;;  %v97_v34 = vstv %s260_s26  ;;  %v72_v35 = vadd.f32 %v70_v21, %v69_v14 }
  0x1d   :  { %v81_v36 = vmax.f32 %v79_v29, 0.0  ;;  %v98_v37 = vmul.f32 %v97_v34, %v57_v24  ;;  %v100_v38 = vstv %s262_s27  ;;  %v80_v39 = vadd.f32 %v78_v26, %v77_v15 }
  0x1e   :  { %v89_v40 = vmax.f32 %v87_v33, 0.0  ;;  %v101_v41 = vmul.f32 %v100_v38, %v65_v28  ;;  %v105_v42 = vstv %s264_s28  ;;  %v74_v43 = vmax.f32 %v72_v35, 0.0 }
  0x1f   :  { %v106_v44 = vmul.f32 %v105_v42, %v73_v32  ;;  %v110_v45 = vstv %s267_s29  ;;  %v82_v46 = vmax.f32 %v80_v39, 0.0  ;;  %v88_v47 = vadd.f32 %v86_v30, %v85_v23 }
  0x20   :  { %v103_v48 = vadd.f32 %v101_v41, %v98_v37  ;;  %v111_v49 = vmul.f32 %v110_v45, %v81_v36  ;;  %v115_v50 = vstv %s270_s30  ;;  %v99_v51 = vmul.f32 %v97_v34, %v58_v27 }
  0x21   :  { %v90_v52 = vmax.f32 %v88_v47, 0.0  ;;  %v102_v53 = vmul.f32 %v100_v38, %v66_v31  ;;  %v116_v55 = vmul.f32 %v115_v50, %v89_v40  ;;  %v107_v56 = vmul.f32 %v105_v42, %v74_v43 }
  0x22   :  { %v108_v54 = vadd.f32 %v106_v44, %v103_v48  ;;  %v112_v58 = vmul.f32 %v110_v45, %v82_v46  ;;  %v120_v60 = vstv %s274_s3 }
  0x23   :  { %v104_v57 = vadd.f32 %v102_v53, %v99_v51  ;;  %v117_v62 = vmul.f32 %v115_v50, %v90_v52 }
  0x24   :  { %v113_v59 = vadd.f32 %v111_v49, %v108_v54 }
  0x25   :  { %v109_v61 = vadd.f32 %v107_v56, %v104_v57 }
  0x26   :  { %v118_v63 = vadd.f32 %v116_v55, %v113_v59 }
  0x27   :  { %v114_v0 = vadd.f32 %v112_v58, %v109_v61 }
  0x28   :  { %v121_v1 = vadd.f32 %v120_v60, %v118_v63 }
  0x29   :  { %v119_v2 = vadd.f32 %v117_v62, %v114_v0 }
  0x2a   :  { %123 = vst [vmem:[#allocation7] sm:$0xff] %v121_v1 }
  0x2b   :  { %v122_v3 = vadd.f32 %v120_v60, %v119_v2 }
  0x2d   :  { %124 = vst [vmem:[#allocation7 + $0x8] sm:$0xff] %v122_v3 }
  0x2e   :  { %135 = dma.vmem_to_hbm [thread:$0]  %s131_s5, 256, %s133_s8, [#allocation4]  }
  0x2f   :  { %225 = dma.done.wait [#allocation4], 256  }
  0x30   :  { %226 = vsyncadd [#allocation4], 4294967040 }
  0x31   :  { %140 = vsyncpa [#allocation3], 1 }
  0x32   :  { %141 = vsyncpa [#allocation4], 1 }
  0x33   :  { %142 = vsyncpa [#allocation5], 1 }

</bundles_post_ra>
